<compile_context>
chip_gen: v5e
topology: v5e:2x2
jax: 0.10.0
libtpu: 0.0.40
codegen_flags: <defaults>
</compile_context>

<pallas_src>
import functools

import jax
import jax.numpy as jnp
from jax import lax
from jax.experimental import pallas as pl
from jax.experimental.pallas import tpu as pltpu


def _corner_kernel(xr_ref, xi_ref, wr_ref, wi_ref, or_ref, oi_ref, *,
                   cin, batch, cout):
    """One (corner, mode-block) grid step of the complex channel contraction.

    Ref shapes (flattened, sublane-dense layouts):
      xr_ref, xi_ref: (Cin*B,    MT)   row i*B + b    = x[b, i]  for this corner
      wr_ref, wi_ref: (Cin*Cout, MT)   row i*Cout + o = w[i, o]
      or_ref, oi_ref: (B*Cout,   MT)   row b*Cout + o = out[b, o]

    out[b,o,m] = sum_i x[b,i,m] * w[i,o,m]   (complex, 4-multiply form)
    """
    mt = xr_ref.shape[-1]

    def step(i, acc_re, acc_im):
        # Weight planes are loaded from VMEM once per Cin step and reused
        # across the whole batch.
        wr = wr_ref[pl.ds(i * cout, cout), :]            # (Cout, MT)
        wi = wi_ref[pl.ds(i * cout, cout), :]
        new_re, new_im = [], []
        for b in range(batch):
            # Broadcast the x row once per (i, b) and reuse it in both
            # multiplies (JAX does not CSE broadcast_in_dim).
            xr = jnp.broadcast_to(xr_ref[pl.ds(i * batch + b, 1), :], (cout, mt))
            xi = jnp.broadcast_to(xi_ref[pl.ds(i * batch + b, 1), :], (cout, mt))
            new_re.append(acc_re[b] + (xr * wr - xi * wi))
            new_im.append(acc_im[b] + (xr * wi + xi * wr))
        return new_re, new_im

    acc_re = [jnp.zeros((cout, mt), jnp.float32) for _ in range(batch)]
    acc_im = [jnp.zeros((cout, mt), jnp.float32) for _ in range(batch)]

    if cin <= 8:
        # Small channel counts: straight-line code for the LLO scheduler.
        for i in range(cin):
            acc_re, acc_im = step(i, acc_re, acc_im)
    else:
        # Production channel counts: visible loop bounds live ranges / compile time.
        def body(i, carry):
            re, im = carry
            re, im = step(i, list(re), list(im))
            return tuple(re), tuple(im)

        acc_re, acc_im = lax.fori_loop(
            0, cin, body, (tuple(acc_re), tuple(acc_im)), unroll=2)

    # Single sublane-dense slab store per grid step (unmasked when B*Cout >= 8).
    or_ref[...] = jnp.concatenate(list(acc_re), axis=0)
    oi_ref[...] = jnp.concatenate(list(acc_im), axis=0)


def _pad_last(a, target):
    m = a.shape[-1]
    if m == target:
        return a
    return jnp.pad(a, [(0, 0)] * (a.ndim - 1) + [(0, target - m)])


def _vmem_params():
    """Generation-gated (tile VMEM budget, vmem_limit_bytes, max mode tile)."""
    cap = 64 * 1024 * 1024
    try:
        cap = int(getattr(pltpu.get_tpu_info(), "vmem_capacity_bytes", cap))
    except Exception:  # conservative fallback (interpret mode / unknown chip)
        pass
    if cap >= 96 * 1024 * 1024:
        # v5e / v6e: 128 MiB physical VMEM -> bigger tiles, fewer grid steps.
        return 52 * 1024 * 1024, 100 * 1024 * 1024, 4096
    # v7x (64 MiB per TensorCore) or unknown: conservative sizes.
    return 24 * 1024 * 1024, 48 * 1024 * 1024, 2048


def _pick_mode_tile(mp, batch, cin, cout, vmem_budget, mt_cap):
    """Largest 128-multiple mode tile that (a) divides mp, (b) keeps the
    double-buffered VMEM footprint under the generation budget, (c) keeps the
    (B*Cout, MT) f32 accumulator pair around <= 32 vregs."""
    # bytes per mode column: (2 x + 2 w + 2 out planes) * f32 * 2 buffers
    bytes_per_mode = 4 * 2 * (2 * cin * batch + 2 * cin * cout + 2 * batch * cout)
    mt_vmem = max(128, (vmem_budget // bytes_per_mode) // 128 * 128)
    mt_vreg = max(128, (16384 // max(batch * cout, 1)) // 128 * 128)
    mt = min(mp, mt_vmem, mt_vreg, mt_cap)
    while mp % mt:
        mt -= 128
    return mt


def _compl_mul_corners(xr, xi, wr, wi, *, cin, batch, cout):
    """xr/xi: (4, Cin*B, Mp); wr/wi: (4, Cin*Cout, Mp) -> re/im (4, B*Cout, Mp)."""
    ncorner, _, mp = xr.shape
    vmem_budget, vmem_limit, mt_cap = _vmem_params()
    mt = _pick_mode_tile(mp, batch, cin, cout, vmem_budget, mt_cap)

    x_spec = pl.BlockSpec((None, cin * batch, mt), lambda c, m: (c, 0, m))
    w_spec = pl.BlockSpec((None, cin * cout, mt), lambda c, m: (c, 0, m))
    o_spec = pl.BlockSpec((None, batch * cout, mt), lambda c, m: (c, 0, m))

    grid_spec = pltpu.PrefetchScalarGridSpec(
        num_scalar_prefetch=0,
        grid=(ncorner, mp // mt),
        in_specs=[x_spec, x_spec, w_spec, w_spec],
        out_specs=[o_spec, o_spec],
    )

    kernel = functools.partial(_corner_kernel, cin=cin, batch=batch, cout=cout)
    return pl.pallas_call(
        kernel,
        grid_spec=grid_spec,
        out_shape=[
            jax.ShapeDtypeStruct((ncorner, batch * cout, mp), jnp.float32),
            jax.ShapeDtypeStruct((ncorner, batch * cout, mp), jnp.float32),
        ],
        compiler_params=pltpu.CompilerParams(
            # corner axis and mode-block axis are independent -> megacore-shardable.
            dimension_semantics=("parallel", "parallel"),
            vmem_limit_bytes=vmem_limit,
        ),
    )(xr, xi, wr, wi)


@functools.partial(jax.jit, static_argnames=("modes1", "modes2", "modes3"))
def spectral_conv3d(x, w_re, w_im, *, modes1, modes2, modes3):
    """Forward pass matching torch SpectralConv3d.

    x:            (B, Cin, D1, D2, D3) float32
    w_re, w_im:   (4, Cin, Cout, modes1, modes2, modes3) float32
                  (real/imag of weights1..weights4 stacked on axis 0)
    returns       (B, Cout, D1, D2, D3) float32
    """
    B, Cin, D1, D2, D3 = x.shape
    Cout = w_re.shape[2]
    m1, m2, m3 = modes1, modes2, modes3
    D3r = D3 // 2 + 1
    M = m1 * m2 * m3
    Mp = ((M + 127) // 128) * 128          # lane-dense / 128-aligned mode axis

    # TODO(synk): rfftn/irfftn have no Pallas TPU equivalent; they stay in XLA.
    x_ft = jnp.fft.rfftn(x, axes=(-3, -2, -1))       # (B, Cin, D1, D2, D3r) complex64

    # Corner gather stays in XLA (non-contiguous 3-D blocks).  Single stacked
    # (re, im) materialization + single pad.
    corners = jnp.stack([x_ft[:, :, :m1, :m2, :m3],
                         x_ft[:, :, -m1:, :m2, :m3],
                         x_ft[:, :, :m1, -m2:, :m3],
                         x_ft[:, :, -m1:, -m2:, :m3]], axis=0)        # (4,B,Cin,m1,m2,m3)
    corners = jnp.transpose(corners, (0, 2, 1, 3, 4, 5)).reshape(4, Cin * B, M)
    x_ri = jnp.stack([jnp.real(corners), jnp.imag(corners)], axis=0)
    x_ri = _pad_last(x_ri.astype(jnp.float32), Mp)                    # (2,4,Cin*B,Mp)

    w_ri = jnp.stack([w_re, w_im], axis=0).astype(jnp.float32)
    w_ri = _pad_last(w_ri.reshape(2, 4, Cin * Cout, M), Mp)           # (2,4,Cin*Cout,Mp)

    # Hot path: complex channel contraction in Pallas.
    out_re, out_im = _compl_mul_corners(
        x_ri[0], x_ri[1], w_ri[0], w_ri[1], cin=Cin, batch=B, cout=Cout)
    out_c = (out_re[..., :M] + 1j * out_im[..., :M]).astype(jnp.complex64)
    out_c = out_c.reshape(4, B, Cout, m1, m2, m3)

    out_ft = jnp.zeros((B, Cout, D1, D2, D3r), jnp.complex64)
    out_ft = out_ft.at[:, :, :m1, :m2, :m3].set(out_c[0])
    out_ft = out_ft.at[:, :, -m1:, :m2, :m3].set(out_c[1])
    out_ft = out_ft.at[:, :, :m1, -m2:, :m3].set(out_c[2])
    out_ft = out_ft.at[:, :, -m1:, -m2:, :m3].set(out_c[3])

    return jnp.fft.irfftn(out_ft, s=(D1, D2, D3), axes=(-3, -2, -1))


def _reference(x, w_re, w_im, m1, m2, m3):
    """Pure-JAX reference (mirrors the torch code verbatim)."""
    B, Cin, D1, D2, D3 = x.shape
    Cout = w_re.shape[2]
    w = (w_re + 1j * w_im).astype(jnp.complex64)
    x_ft = jnp.fft.rfftn(x, axes=(-3, -2, -1))
    out_ft = jnp.zeros((B, Cout, D1, D2, D3 // 2 + 1), jnp.complex64)
    mul = lambda a, ww: jnp.einsum("bixyz,ioxyz->boxyz", a, ww)
    out_ft = out_ft.at[:, :, :m1, :m2, :m3].set(
        mul(x_ft[:, :, :m1, :m2, :m3], w[0]))
    out_ft = out_ft.at[:, :, -m1:, :m2, :m3].set(
        mul(x_ft[:, :, -m1:, :m2, :m3], w[1]))
    out_ft = out_ft.at[:, :, :m1, -m2:, :m3].set(
        mul(x_ft[:, :, :m1, -m2:, :m3], w[2]))
    out_ft = out_ft.at[:, :, -m1:, -m2:, :m3].set(
        mul(x_ft[:, :, -m1:, -m2:, :m3], w[3]))
    return jnp.fft.irfftn(out_ft, s=(D1, D2, D3), axes=(-3, -2, -1))


if __name__ == "__main__":
    # Small, deterministic configuration consistent with the module.
    B, Cin, Cout = 2, 4, 4
    D1 = D2 = D3 = 16
    m1 = m2 = m3 = 4

    key = jax.random.PRNGKey(0)
    kx, kwr, kwi = jax.random.split(key, 3)

    x = jax.random.normal(kx, (B, Cin, D1, D2, D3), dtype=jnp.float32)

    # torch.rand(..., dtype=cfloat) -> real & imag uniform in [0,1), scaled.
    scale = 1.0 / (Cin * Cout)
    w_shape = (4, Cin, Cout, m1, m2, m3)  # weights1..weights4 stacked
    w_re = scale * jax.random.uniform(kwr, w_shape, dtype=jnp.float32)
    w_im = scale * jax.random.uniform(kwi, w_shape, dtype=jnp.float32)

    y = spectral_conv3d(x, w_re, w_im, modes1=m1, modes2=m2, modes3=m3)
    y = jax.block_until_ready(y)

    y_ref = _reference(x, w_re, w_im, m1, m2, m3)
    assert y.shape == (B, Cout, D1, D2, D3)
    assert y.dtype == jnp.float32
    assert jnp.allclose(y, y_ref, rtol=1e-4, atol=1e-5), "mismatch vs reference"

    print("KERNEL_OK")
</pallas_src>

<mosaic_0001>
module attributes {stable_mosaic.version = 11 : i64} {
  func.func @_corner_kernel(%arg0: i32, %arg1: i32, %arg2: memref<1x8x128xf32, #tpu.memory_space<vmem>>, %arg3: memref<1x8x128xf32, #tpu.memory_space<vmem>>, %arg4: memref<1x16x128xf32, #tpu.memory_space<vmem>>, %arg5: memref<1x16x128xf32, #tpu.memory_space<vmem>>, %arg6: memref<1x8x128xf32, #tpu.memory_space<vmem>>, %arg7: memref<1x8x128xf32, #tpu.memory_space<vmem>>) attributes {dimension_semantics = [#tpu.dimension_semantics<parallel>, #tpu.dimension_semantics<parallel>], iteration_bounds = array<i64: 4, 1>, scalar_prefetch = 0 : i64, scratch_operands = 0 : i64, tpu.core_type = #tpu.core_type<tc>, window_params = [{transform_indices = @transform_0, window_bounds = array<i64: 1, 8, 128>}, {transform_indices = @transform_1, window_bounds = array<i64: 1, 8, 128>}, {transform_indices = @transform_2, window_bounds = array<i64: 1, 16, 128>}, {transform_indices = @transform_3, window_bounds = array<i64: 1, 16, 128>}, {transform_indices = @transform_4, window_bounds = array<i64: 1, 8, 128>}, {transform_indices = @transform_5, window_bounds = array<i64: 1, 8, 128>}]} {
    %cst = arith.constant 0.000000e+00 : f32
    %0 = vector.broadcast %cst : f32 to vector<4x128xf32>
    %cst_0 = arith.constant 0.000000e+00 : f32
    %1 = vector.broadcast %cst_0 : f32 to vector<4x128xf32>
    %cst_1 = arith.constant 0.000000e+00 : f32
    %2 = vector.broadcast %cst_1 : f32 to vector<4x128xf32>
    %cst_2 = arith.constant 0.000000e+00 : f32
    %3 = vector.broadcast %cst_2 : f32 to vector<4x128xf32>
    %c0 = arith.constant 0 : index
    %c0_3 = arith.constant 0 : index
    %c0_4 = arith.constant 0 : index
    %4 = vector.load %arg4[%c0, %c0_3, %c0_4] : memref<1x16x128xf32, #tpu.memory_space<vmem>>, vector<1x4x128xf32>
    %5 = vector.shape_cast %4 : vector<1x4x128xf32> to vector<4x128xf32>
    %c0_5 = arith.constant 0 : index
    %c0_6 = arith.constant 0 : index
    %c0_7 = arith.constant 0 : index
    %6 = vector.load %arg5[%c0_5, %c0_6, %c0_7] : memref<1x16x128xf32, #tpu.memory_space<vmem>>, vector<1x4x128xf32>
    %7 = vector.shape_cast %6 : vector<1x4x128xf32> to vector<4x128xf32>
    %c0_8 = arith.constant 0 : index
    %c0_9 = arith.constant 0 : index
    %c0_10 = arith.constant 0 : index
    %8 = vector.load %arg2[%c0_8, %c0_9, %c0_10] : memref<1x8x128xf32, #tpu.memory_space<vmem>>, vector<1x1x128xf32>
    %9 = vector.shape_cast %8 : vector<1x1x128xf32> to vector<1x128xf32>
    %10 = vector.shape_cast %9 : vector<1x128xf32> to vector<1x128xf32>
    %11 = vector.broadcast %10 : vector<1x128xf32> to vector<4x128xf32>
    %c0_11 = arith.constant 0 : index
    %c0_12 = arith.constant 0 : index
    %c0_13 = arith.constant 0 : index
    %12 = vector.load %arg3[%c0_11, %c0_12, %c0_13] : memref<1x8x128xf32, #tpu.memory_space<vmem>>, vector<1x1x128xf32>
    %13 = vector.shape_cast %12 : vector<1x1x128xf32> to vector<1x128xf32>
    %14 = vector.shape_cast %13 : vector<1x128xf32> to vector<1x128xf32>
    %15 = vector.broadcast %14 : vector<1x128xf32> to vector<4x128xf32>
    %16 = arith.mulf %11, %5 : vector<4x128xf32>
    %17 = arith.mulf %15, %7 : vector<4x128xf32>
    %18 = arith.subf %16, %17 : vector<4x128xf32>
    %19 = arith.addf %0, %18 : vector<4x128xf32>
    %20 = arith.mulf %11, %7 : vector<4x128xf32>
    %21 = arith.mulf %15, %5 : vector<4x128xf32>
    %22 = arith.addf %20, %21 : vector<4x128xf32>
    %23 = arith.addf %2, %22 : vector<4x128xf32>
    %c0_14 = arith.constant 0 : index
    %c1 = arith.constant 1 : index
    %c0_15 = arith.constant 0 : index
    %24 = vector.load %arg2[%c0_14, %c1, %c0_15] : memref<1x8x128xf32, #tpu.memory_space<vmem>>, vector<1x1x128xf32>
    %25 = vector.shape_cast %24 : vector<1x1x128xf32> to vector<1x128xf32>
    %26 = vector.shape_cast %25 : vector<1x128xf32> to vector<1x128xf32>
    %27 = vector.broadcast %26 : vector<1x128xf32> to vector<4x128xf32>
    %c0_16 = arith.constant 0 : index
    %c1_17 = arith.constant 1 : index
    %c0_18 = arith.constant 0 : index
    %28 = vector.load %arg3[%c0_16, %c1_17, %c0_18] : memref<1x8x128xf32, #tpu.memory_space<vmem>>, vector<1x1x128xf32>
    %29 = vector.shape_cast %28 : vector<1x1x128xf32> to vector<1x128xf32>
    %30 = vector.shape_cast %29 : vector<1x128xf32> to vector<1x128xf32>
    %31 = vector.broadcast %30 : vector<1x128xf32> to vector<4x128xf32>
    %32 = arith.mulf %27, %5 : vector<4x128xf32>
    %33 = arith.mulf %31, %7 : vector<4x128xf32>
    %34 = arith.subf %32, %33 : vector<4x128xf32>
    %35 = arith.addf %1, %34 : vector<4x128xf32>
    %36 = arith.mulf %27, %7 : vector<4x128xf32>
    %37 = arith.mulf %31, %5 : vector<4x128xf32>
    %38 = arith.addf %36, %37 : vector<4x128xf32>
    %39 = arith.addf %3, %38 : vector<4x128xf32>
    %c0_19 = arith.constant 0 : index
    %c4 = arith.constant 4 : index
    %c0_20 = arith.constant 0 : index
    %40 = vector.load %arg4[%c0_19, %c4, %c0_20] : memref<1x16x128xf32, #tpu.memory_space<vmem>>, vector<1x4x128xf32>
    %41 = vector.shape_cast %40 : vector<1x4x128xf32> to vector<4x128xf32>
    %c0_21 = arith.constant 0 : index
    %c4_22 = arith.constant 4 : index
    %c0_23 = arith.constant 0 : index
    %42 = vector.load %arg5[%c0_21, %c4_22, %c0_23] : memref<1x16x128xf32, #tpu.memory_space<vmem>>, vector<1x4x128xf32>
    %43 = vector.shape_cast %42 : vector<1x4x128xf32> to vector<4x128xf32>
    %c0_24 = arith.constant 0 : index
    %c2 = arith.constant 2 : index
    %c0_25 = arith.constant 0 : index
    %44 = vector.load %arg2[%c0_24, %c2, %c0_25] : memref<1x8x128xf32, #tpu.memory_space<vmem>>, vector<1x1x128xf32>
    %45 = vector.shape_cast %44 : vector<1x1x128xf32> to vector<1x128xf32>
    %46 = vector.shape_cast %45 : vector<1x128xf32> to vector<1x128xf32>
    %47 = vector.broadcast %46 : vector<1x128xf32> to vector<4x128xf32>
    %c0_26 = arith.constant 0 : index
    %c2_27 = arith.constant 2 : index
    %c0_28 = arith.constant 0 : index
    %48 = vector.load %arg3[%c0_26, %c2_27, %c0_28] : memref<1x8x128xf32, #tpu.memory_space<vmem>>, vector<1x1x128xf32>
    %49 = vector.shape_cast %48 : vector<1x1x128xf32> to vector<1x128xf32>
    %50 = vector.shape_cast %49 : vector<1x128xf32> to vector<1x128xf32>
    %51 = vector.broadcast %50 : vector<1x128xf32> to vector<4x128xf32>
    %52 = arith.mulf %47, %41 : vector<4x128xf32>
    %53 = arith.mulf %51, %43 : vector<4x128xf32>
    %54 = arith.subf %52, %53 : vector<4x128xf32>
    %55 = arith.addf %19, %54 : vector<4x128xf32>
    %56 = arith.mulf %47, %43 : vector<4x128xf32>
    %57 = arith.mulf %51, %41 : vector<4x128xf32>
    %58 = arith.addf %56, %57 : vector<4x128xf32>
    %59 = arith.addf %23, %58 : vector<4x128xf32>
    %c0_29 = arith.constant 0 : index
    %c3 = arith.constant 3 : index
    %c0_30 = arith.constant 0 : index
    %60 = vector.load %arg2[%c0_29, %c3, %c0_30] : memref<1x8x128xf32, #tpu.memory_space<vmem>>, vector<1x1x128xf32>
    %61 = vector.shape_cast %60 : vector<1x1x128xf32> to vector<1x128xf32>
    %62 = vector.shape_cast %61 : vector<1x128xf32> to vector<1x128xf32>
    %63 = vector.broadcast %62 : vector<1x128xf32> to vector<4x128xf32>
    %c0_31 = arith.constant 0 : index
    %c3_32 = arith.constant 3 : index
    %c0_33 = arith.constant 0 : index
    %64 = vector.load %arg3[%c0_31, %c3_32, %c0_33] : memref<1x8x128xf32, #tpu.memory_space<vmem>>, vector<1x1x128xf32>
    %65 = vector.shape_cast %64 : vector<1x1x128xf32> to vector<1x128xf32>
    %66 = vector.shape_cast %65 : vector<1x128xf32> to vector<1x128xf32>
    %67 = vector.broadcast %66 : vector<1x128xf32> to vector<4x128xf32>
    %68 = arith.mulf %63, %41 : vector<4x128xf32>
    %69 = arith.mulf %67, %43 : vector<4x128xf32>
    %70 = arith.subf %68, %69 : vector<4x128xf32>
    %71 = arith.addf %35, %70 : vector<4x128xf32>
    %72 = arith.mulf %63, %43 : vector<4x128xf32>
    %73 = arith.mulf %67, %41 : vector<4x128xf32>
    %74 = arith.addf %72, %73 : vector<4x128xf32>
    %75 = arith.addf %39, %74 : vector<4x128xf32>
    %c0_34 = arith.constant 0 : index
    %c8 = arith.constant 8 : index
    %c0_35 = arith.constant 0 : index
    %76 = vector.load %arg4[%c0_34, %c8, %c0_35] : memref<1x16x128xf32, #tpu.memory_space<vmem>>, vector<1x4x128xf32>
    %77 = vector.shape_cast %76 : vector<1x4x128xf32> to vector<4x128xf32>
    %c0_36 = arith.constant 0 : index
    %c8_37 = arith.constant 8 : index
    %c0_38 = arith.constant 0 : index
    %78 = vector.load %arg5[%c0_36, %c8_37, %c0_38] : memref<1x16x128xf32, #tpu.memory_space<vmem>>, vector<1x4x128xf32>
    %79 = vector.shape_cast %78 : vector<1x4x128xf32> to vector<4x128xf32>
    %c0_39 = arith.constant 0 : index
    %c4_40 = arith.constant 4 : index
    %c0_41 = arith.constant 0 : index
    %80 = vector.load %arg2[%c0_39, %c4_40, %c0_41] : memref<1x8x128xf32, #tpu.memory_space<vmem>>, vector<1x1x128xf32>
    %81 = vector.shape_cast %80 : vector<1x1x128xf32> to vector<1x128xf32>
    %82 = vector.shape_cast %81 : vector<1x128xf32> to vector<1x128xf32>
    %83 = vector.broadcast %82 : vector<1x128xf32> to vector<4x128xf32>
    %c0_42 = arith.constant 0 : index
    %c4_43 = arith.constant 4 : index
    %c0_44 = arith.constant 0 : index
    %84 = vector.load %arg3[%c0_42, %c4_43, %c0_44] : memref<1x8x128xf32, #tpu.memory_space<vmem>>, vector<1x1x128xf32>
    %85 = vector.shape_cast %84 : vector<1x1x128xf32> to vector<1x128xf32>
    %86 = vector.shape_cast %85 : vector<1x128xf32> to vector<1x128xf32>
    %87 = vector.broadcast %86 : vector<1x128xf32> to vector<4x128xf32>
    %88 = arith.mulf %83, %77 : vector<4x128xf32>
    %89 = arith.mulf %87, %79 : vector<4x128xf32>
    %90 = arith.subf %88, %89 : vector<4x128xf32>
    %91 = arith.addf %55, %90 : vector<4x128xf32>
    %92 = arith.mulf %83, %79 : vector<4x128xf32>
    %93 = arith.mulf %87, %77 : vector<4x128xf32>
    %94 = arith.addf %92, %93 : vector<4x128xf32>
    %95 = arith.addf %59, %94 : vector<4x128xf32>
    %c0_45 = arith.constant 0 : index
    %c5 = arith.constant 5 : index
    %c0_46 = arith.constant 0 : index
    %96 = vector.load %arg2[%c0_45, %c5, %c0_46] : memref<1x8x128xf32, #tpu.memory_space<vmem>>, vector<1x1x128xf32>
    %97 = vector.shape_cast %96 : vector<1x1x128xf32> to vector<1x128xf32>
    %98 = vector.shape_cast %97 : vector<1x128xf32> to vector<1x128xf32>
    %99 = vector.broadcast %98 : vector<1x128xf32> to vector<4x128xf32>
    %c0_47 = arith.constant 0 : index
    %c5_48 = arith.constant 5 : index
    %c0_49 = arith.constant 0 : index
    %100 = vector.load %arg3[%c0_47, %c5_48, %c0_49] : memref<1x8x128xf32, #tpu.memory_space<vmem>>, vector<1x1x128xf32>
    %101 = vector.shape_cast %100 : vector<1x1x128xf32> to vector<1x128xf32>
    %102 = vector.shape_cast %101 : vector<1x128xf32> to vector<1x128xf32>
    %103 = vector.broadcast %102 : vector<1x128xf32> to vector<4x128xf32>
    %104 = arith.mulf %99, %77 : vector<4x128xf32>
    %105 = arith.mulf %103, %79 : vector<4x128xf32>
    %106 = arith.subf %104, %105 : vector<4x128xf32>
    %107 = arith.addf %71, %106 : vector<4x128xf32>
    %108 = arith.mulf %99, %79 : vector<4x128xf32>
    %109 = arith.mulf %103, %77 : vector<4x128xf32>
    %110 = arith.addf %108, %109 : vector<4x128xf32>
    %111 = arith.addf %75, %110 : vector<4x128xf32>
    %c0_50 = arith.constant 0 : index
    %c12 = arith.constant 12 : index
    %c0_51 = arith.constant 0 : index
    %112 = vector.load %arg4[%c0_50, %c12, %c0_51] : memref<1x16x128xf32, #tpu.memory_space<vmem>>, vector<1x4x128xf32>
    %113 = vector.shape_cast %112 : vector<1x4x128xf32> to vector<4x128xf32>
    %c0_52 = arith.constant 0 : index
    %c12_53 = arith.constant 12 : index
    %c0_54 = arith.constant 0 : index
    %114 = vector.load %arg5[%c0_52, %c12_53, %c0_54] : memref<1x16x128xf32, #tpu.memory_space<vmem>>, vector<1x4x128xf32>
    %115 = vector.shape_cast %114 : vector<1x4x128xf32> to vector<4x128xf32>
    %c0_55 = arith.constant 0 : index
    %c6 = arith.constant 6 : index
    %c0_56 = arith.constant 0 : index
    %116 = vector.load %arg2[%c0_55, %c6, %c0_56] : memref<1x8x128xf32, #tpu.memory_space<vmem>>, vector<1x1x128xf32>
    %117 = vector.shape_cast %116 : vector<1x1x128xf32> to vector<1x128xf32>
    %118 = vector.shape_cast %117 : vector<1x128xf32> to vector<1x128xf32>
    %119 = vector.broadcast %118 : vector<1x128xf32> to vector<4x128xf32>
    %c0_57 = arith.constant 0 : index
    %c6_58 = arith.constant 6 : index
    %c0_59 = arith.constant 0 : index
    %120 = vector.load %arg3[%c0_57, %c6_58, %c0_59] : memref<1x8x128xf32, #tpu.memory_space<vmem>>, vector<1x1x128xf32>
    %121 = vector.shape_cast %120 : vector<1x1x128xf32> to vector<1x128xf32>
    %122 = vector.shape_cast %121 : vector<1x128xf32> to vector<1x128xf32>
    %123 = vector.broadcast %122 : vector<1x128xf32> to vector<4x128xf32>
    %124 = arith.mulf %119, %113 : vector<4x128xf32>
    %125 = arith.mulf %123, %115 : vector<4x128xf32>
    %126 = arith.subf %124, %125 : vector<4x128xf32>
    %127 = arith.addf %91, %126 : vector<4x128xf32>
    %128 = arith.mulf %119, %115 : vector<4x128xf32>
    %129 = arith.mulf %123, %113 : vector<4x128xf32>
    %130 = arith.addf %128, %129 : vector<4x128xf32>
    %131 = arith.addf %95, %130 : vector<4x128xf32>
    %c0_60 = arith.constant 0 : index
    %c7 = arith.constant 7 : index
    %c0_61 = arith.constant 0 : index
    %132 = vector.load %arg2[%c0_60, %c7, %c0_61] : memref<1x8x128xf32, #tpu.memory_space<vmem>>, vector<1x1x128xf32>
    %133 = vector.shape_cast %132 : vector<1x1x128xf32> to vector<1x128xf32>
    %134 = vector.shape_cast %133 : vector<1x128xf32> to vector<1x128xf32>
    %135 = vector.broadcast %134 : vector<1x128xf32> to vector<4x128xf32>
    %c0_62 = arith.constant 0 : index
    %c7_63 = arith.constant 7 : index
    %c0_64 = arith.constant 0 : index
    %136 = vector.load %arg3[%c0_62, %c7_63, %c0_64] : memref<1x8x128xf32, #tpu.memory_space<vmem>>, vector<1x1x128xf32>
    %137 = vector.shape_cast %136 : vector<1x1x128xf32> to vector<1x128xf32>
    %138 = vector.shape_cast %137 : vector<1x128xf32> to vector<1x128xf32>
    %139 = vector.broadcast %138 : vector<1x128xf32> to vector<4x128xf32>
    %140 = arith.mulf %135, %113 : vector<4x128xf32>
    %141 = arith.mulf %139, %115 : vector<4x128xf32>
    %142 = arith.subf %140, %141 : vector<4x128xf32>
    %143 = arith.addf %107, %142 : vector<4x128xf32>
    %144 = arith.mulf %135, %115 : vector<4x128xf32>
    %145 = arith.mulf %139, %113 : vector<4x128xf32>
    %146 = arith.addf %144, %145 : vector<4x128xf32>
    %147 = arith.addf %111, %146 : vector<4x128xf32>
    %148 = tpu.concatenate %127, %143 in 0 : vector<4x128xf32>, vector<4x128xf32> -> vector<8x128xf32>
    %c0_65 = arith.constant 0 : index
    %c0_66 = arith.constant 0 : index
    %c0_67 = arith.constant 0 : index
    %149 = vector.load %arg6[%c0_65, %c0_66, %c0_67] : memref<1x8x128xf32, #tpu.memory_space<vmem>>, vector<1x8x128xf32>
    %150 = vector.shape_cast %149 : vector<1x8x128xf32> to vector<8x128xf32>
    %151 = vector.shape_cast %148 : vector<8x128xf32> to vector<1x8x128xf32>
    tpu.vector_store %arg6[%c0_65, %c0_66, %c0_67], %151 {strides = array<i32>} : memref<1x8x128xf32, #tpu.memory_space<vmem>>, vector<1x8x128xf32>,
    %152 = tpu.concatenate %131, %147 in 0 : vector<4x128xf32>, vector<4x128xf32> -> vector<8x128xf32>
    %c0_68 = arith.constant 0 : index
    %c0_69 = arith.constant 0 : index
    %c0_70 = arith.constant 0 : index
    %153 = vector.load %arg7[%c0_68, %c0_69, %c0_70] : memref<1x8x128xf32, #tpu.memory_space<vmem>>, vector<1x8x128xf32>
    %154 = vector.shape_cast %153 : vector<1x8x128xf32> to vector<8x128xf32>
    %155 = vector.shape_cast %152 : vector<8x128xf32> to vector<1x8x128xf32>
    tpu.vector_store %arg7[%c0_68, %c0_69, %c0_70], %155 {strides = array<i32>} : memref<1x8x128xf32, #tpu.memory_space<vmem>>, vector<1x8x128xf32>,
    return
  }
  func.func @transform_0(%arg0: i32, %arg1: i32) -> (i32, i32, i32) {
    %c0_i32 = arith.constant 0 : i32
    %c0_i32_0 = arith.constant 0 : i32
    return %arg0, %c0_i32, %arg1 : i32, i32, i32
  }
  func.func @transform_1(%arg0: i32, %arg1: i32) -> (i32, i32, i32) {
    %c0_i32 = arith.constant 0 : i32
    %c0_i32_0 = arith.constant 0 : i32
    return %arg0, %c0_i32, %arg1 : i32, i32, i32
  }
  func.func @transform_2(%arg0: i32, %arg1: i32) -> (i32, i32, i32) {
    %c0_i32 = arith.constant 0 : i32
    %c0_i32_0 = arith.constant 0 : i32
    return %arg0, %c0_i32, %arg1 : i32, i32, i32
  }
  func.func @transform_3(%arg0: i32, %arg1: i32) -> (i32, i32, i32) {
    %c0_i32 = arith.constant 0 : i32
    %c0_i32_0 = arith.constant 0 : i32
    return %arg0, %c0_i32, %arg1 : i32, i32, i32
  }
  func.func @transform_4(%arg0: i32, %arg1: i32) -> (i32, i32, i32) {
    %c0_i32 = arith.constant 0 : i32
    %c0_i32_0 = arith.constant 0 : i32
    return %arg0, %c0_i32, %arg1 : i32, i32, i32
  }
  func.func @transform_5(%arg0: i32, %arg1: i32) -> (i32, i32, i32) {
    %c0_i32 = arith.constant 0 : i32
    %c0_i32_0 = arith.constant 0 : i32
    return %arg0, %c0_i32, %arg1 : i32, i32, i32
  }
}

</mosaic_0001>

<bundles_post_ra>
// kernel: spectral_conv3d.1
= control target key start
LH: loop header
LB: loop body
LE: loop exit
PB: predicated region body
PF: predicated region fallthrough
CT: control target
= control target key end

     0   :  { %s752_s18 = smov 0   ;;  %s754_s19 = smov 0   ;;  %s835_s0 = inlined_call_operand.vmem [shape: f32[4,8,128], index: 0, kind: input, shape index: {}]   ;;  %s836_s1 = inlined_call_operand.vmem [shape: f32[4,8,128], index: 1, kind: input, shape index: {}]   ;;  %s837_s2 = inlined_call_operand.vmem [shape: f32[4,16,128], index: 2, kind: input, shape index: {}]   ;;  %s838_s3 = inlined_call_operand.vmem [shape: f32[4,16,128], index: 3, kind: input, shape index: {}]   ;;  %s839_s4 = inlined_call_operand.vmem [shape: f32[4,8,128], index: 4, kind: output, shape index: {0}]   ;;  %s840_s5 = inlined_call_operand.vmem [shape: f32[4,8,128], index: 5, kind: output, shape index: {1}]  }
   0x1   :  { %s756_s20 = smov 0  }
   0x2 LB: > { %s28_s21 = sadd.s32 1, %s716_s19  ;;  %p645_p0 = scmp.ge.s32.totalorder %s720_s20, 1  ;;  %s720_s20 = sphi %s756_s20, %s16_s20   ;;  %s716_s19 = sphi %s754_s19, %s842_s19   ;;  %s712_s18 = sphi %s752_s18, %s841_s18  }
   0x3   : > { %p30_p1 = scmp.ge.s32.totalorder %s28_s21, 4  ;;  %p254_p2 = scmp.lt.s32.totalorder %s720_s20, 5 }
   0x5   : > { %s844_s21 = smov (%p30_p1, %s28_s21), 0  ;;  %p255_p3 = pnand %p645_p0, %p254_p2 }
   0x6   : > { %p316_p4 = scmp.lt.s32.totalorder (!%p255_p3), %s712_s18, 3 }
   0x7   : > { %258 = sbr.rel (%p255_p3) target bundleno = 40 (0x28), region = 36 }
   0xc   : > { %s846_s18 = smov (!%p316_p4, %s712_s18), 3  ;;  %vm467_vm0 = vcmask 1043456  }
   0xd   : > { %s770_s22 = sshll.u32 %s846_s18, 3  ;;  %s656_s23 = sshll.u32 %s846_s18, 4 }
   0xe   : > { %s776_s26 = scalar_lea.vmem %s835_s0, %s770_s22  ;;  %s782_s29 = scalar_lea.vmem %s836_s1, %s770_s22 }
   0xf   : > { %s787_s7 = scalar_lea.vmem %s837_s2, %s656_s23  ;;  %s792_s10 = scalar_lea.vmem %s838_s3, %s656_s23  ;;  %v682_v0 = vld [vmem:[%s776_s26] ss:$0 sm:$0xff]  ;;  %v684_v5 = vld [vmem:[%s776_s26 + $0x1] ss:$0 sm:$0xff]  ;;  %v686_v13 = vld [vmem:[%s776_s26 + $0x2] ss:$0 sm:$0xff] }
  0x10   : > { %v360_v1 = vld [vmem:[%s787_s7] sm:$0xf]  ;;  %v386_v8 = vld [vmem:[%s787_s7 + $0x4] sm:$0xf]  ;;  %v412_v22 = vld [vmem:[%s787_s7 + $0x8] sm:$0xf]  ;;  %s352_s13 = scalar_lea.vmem %s839_s4, %s770_s22  ;;  %s359_s16 = scalar_lea.vmem %s840_s5, %s770_s22 }
  0x11   : > { %v361_v2 = vld [vmem:[%s792_s10] sm:$0xf]  ;;  %v366_v4 = vmul.f32 %v682_v0, %v360_v1  ;;  %v387_v9 = vld [vmem:[%s792_s10 + $0x4] sm:$0xf]  ;;  %v378_v12 = vmul.f32 %v684_v5, %v360_v1  ;;  %v392_v20 = vmul.f32 %v686_v13, %v386_v8  ;;  %v413_v27 = vld [vmem:[%s792_s10 + $0x8] sm:$0xf] }
  0x12   : > { %v683_v3 = vld [vmem:[%s782_s29] ss:$0 sm:$0xff]  ;;  %v685_v7 = vld [vmem:[%s782_s29 + $0x1] ss:$0 sm:$0xff]  ;;  %v370_v10 = vmul.f32 %v682_v0, %v361_v2  ;;  %v687_v15 = vld [vmem:[%s782_s29 + $0x2] ss:$0 sm:$0xff]  ;;  %v382_v17 = vmul.f32 %v684_v5, %v361_v2  ;;  %v396_v23 = vmul.f32 %v686_v13, %v387_v9 }
  0x13   : > { %v367_v6 = vmul.f32 %v683_v3, %v361_v2  ;;  %v371_v11 = vmul.f32 %v683_v3, %v360_v1  ;;  %v379_v14 = vmul.f32 %v685_v7, %v361_v2  ;;  %v688_v16 = vld [vmem:[%s776_s26 + $0x3] ss:$0 sm:$0xff]  ;;  %v383_v18 = vmul.f32 %v685_v7, %v360_v1  ;;  %v690_v28 = vld [vmem:[%s776_s26 + $0x4] ss:$0 sm:$0xff]  ;;  %v692_v37 = vld [vmem:[%s776_s26 + $0x5] ss:$0 sm:$0xff] }
  0x14   : > { %v689_v21 = vld [vmem:[%s782_s29 + $0x3] ss:$0 sm:$0xff]  ;;  %v393_v25 = vmul.f32 %v687_v15, %v387_v9  ;;  %v404_v26 = vmul.f32 %v688_v16, %v386_v8  ;;  %v691_v31 = vld [vmem:[%s782_s29 + $0x4] ss:$0 sm:$0xff]  ;;  %v397_v32 = vmul.f32 %v687_v15, %v386_v8  ;;  %v408_v33 = vmul.f32 %v688_v16, %v387_v9  ;;  %v693_v38 = vld [vmem:[%s782_s29 + $0x5] ss:$0 sm:$0xff] }
  0x15   : > { %v368_v19 = vsub.f32 %v366_v4, %v367_v6  ;;  %v380_v24 = vsub.f32 %v378_v12, %v379_v14  ;;  %v372_v29 = vadd.f32 %v371_v11, %v370_v10  ;;  %v405_v30 = vmul.f32 %v689_v21, %v387_v9  ;;  %v438_v43 = vld [vmem:[%s787_s7 + $0xc] sm:$0xf]  ;;  %v694_v50 = vld [vmem:[%s776_s26 + $0x6] ss:$0 sm:$0xff]  ;;  %v696_v55 = vld [vmem:[%s776_s26 + $0x7] ss:$0 sm:$0xff] }
  0x16   : > { %v409_v34 = vmul.f32 %v689_v21, %v386_v8  ;;  %v394_v35 = vsub.f32 %v392_v20, %v393_v25  ;;  %v418_v36 = vmul.f32 %v690_v28, %v412_v22  ;;  %v384_v39 = vadd.f32 %v383_v18, %v382_v17  ;;  %v439_v44 = vld [vmem:[%s792_s10 + $0xc] sm:$0xf]  ;;  %v695_v51 = vld [vmem:[%s782_s29 + $0x6] ss:$0 sm:$0xff]  ;;  %v697_v60 = vld [vmem:[%s782_s29 + $0x7] ss:$0 sm:$0xff] }
  0x17   : > { %v422_v40 = vmul.f32 %v690_v28, %v413_v27  ;;  %v406_v41 = vsub.f32 %v404_v26, %v405_v30  ;;  %v419_v42 = vmul.f32 %v691_v31, %v413_v27  ;;  %v398_v45 = vadd.f32 %v397_v32, %v396_v23 }
  0x18   : > { %v410_v46 = vadd.f32 %v409_v34, %v408_v33  ;;  %v395_v47 = vadd.f32 %v394_v35, %v368_v19  ;;  %v430_v48 = vmul.f32 %v692_v37, %v412_v22  ;;  %v431_v49 = vmul.f32 %v693_v38, %v413_v27 }
  0x19   : > { %v423_v52 = vmul.f32 %v691_v31, %v412_v22  ;;  %v407_v53 = vadd.f32 %v406_v41, %v380_v24  ;;  %v420_v54 = vsub.f32 %v418_v36, %v419_v42  ;;  %v399_v56 = vadd.f32 %v398_v45, %v372_v29 }
  0x1a   : > { %v432_v57 = vsub.f32 %v430_v48, %v431_v49  ;;  %v444_v58 = vmul.f32 %v694_v50, %v438_v43  ;;  %v445_v59 = vmul.f32 %v695_v51, %v439_v44  ;;  %v456_v62 = vmul.f32 %v696_v55, %v438_v43 }
  0x1b   : > { %v424_v61 = vadd.f32 %v423_v52, %v422_v40  ;;  %v411_v63 = vadd.f32 %v410_v46, %v384_v39  ;;  %v434_v0 = vmul.f32 %v692_v37, %v413_v27  ;;  %v435_v1 = vmul.f32 %v693_v38, %v412_v22 }
  0x1c   : > { %v421_v2 = vadd.f32 %v420_v54, %v395_v47  ;;  %v433_v3 = vadd.f32 %v432_v57, %v407_v53  ;;  %v446_v4 = vsub.f32 %v444_v58, %v445_v59  ;;  %v457_v5 = vmul.f32 %v697_v60, %v439_v44 }
  0x1d   : > { %v436_v6 = vadd.f32 %v435_v1, %v434_v0  ;;  %v448_v7 = vmul.f32 %v694_v50, %v439_v44  ;;  %v449_v8 = vmul.f32 %v695_v51, %v438_v43  ;;  %v460_v9 = vmul.f32 %v696_v55, %v439_v44 }
  0x1e   : > { %v458_v10 = vsub.f32 %v456_v62, %v457_v5  ;;  %v425_v11 = vadd.f32 %v424_v61, %v399_v56  ;;  %v461_v12 = vmul.f32 %v697_v60, %v438_v43  ;;  %v447_v15 = vadd.f32 %v446_v4, %v421_v2 }
  0x1f   : > { %v437_v13 = vadd.f32 %v436_v6, %v411_v63  ;;  %v450_v14 = vadd.f32 %v449_v8, %v448_v7 }
  0x20   : > { %v459_v16 = vadd.f32 %v458_v10, %v433_v3  ;;  %v462_v17 = vadd.f32 %v461_v12, %v460_v9 }
  0x21   : > { %v451_v19 = vadd.f32 %v450_v14, %v425_v11 }
  0x22   : > { %v465_v18 = vrot.slane %v459_v16, 4  ;;  %v463_v20 = vadd.f32 %v462_v17, %v437_v13 }
  0x24   : > { %v468_v21 = vsel %vm467_vm0, %v447_v15, %v465_v18  ;;  %v471_v22 = vrot.slane %v463_v20, 4 }
  0x25   : > { %469 = vst [vmem:[%s352_s13] sm:$0xff] %v468_v21 }
  0x26   : > { %v473_v23 = vsel %vm467_vm0, %v451_v19, %v471_v22 }
  0x27   : > { %474 = vst [vmem:[%s359_s16] sm:$0xff] %v473_v23 }
  0x28 PF: > { %s16_s20 = sadd.s32 1, %s720_s20   ;;  %s841_s18 = smov %s716_s19 }
  0x29   : > { %p13_p5 = scmp.ge.s32.totalorder %s16_s20, 6   ;;  %s842_s19 = smov %s844_s21 }
  0x2b   :  { %15 = sbr.rel (!%p13_p5) target bundleno = 2 (0x2), region = 87 }

// kernel: reverse.1
= control target key start
LH: loop header
LB: loop body
LE: loop exit
PB: predicated region body
PF: predicated region fallthrough
CT: control target
= control target key end

     0   :  { %s1352_s0 = inlined_call_operand.vmem [shape: f32[2,4,16,16,7], index: 0, kind: input, shape index: {}]   ;;  %s1353_s1 = inlined_call_operand.vmem [shape: f32[2,4,16,16,7], index: 1, kind: output, shape index: {}]  }
   0x1   :  { %v448_v0 = vld [vmem:[%s1352_s0 + $0x60] sm:$0xff]  ;;  %v451_v2 = vld [vmem:[%s1352_s0 + $0xd0] sm:$0xff]  ;;  %v558_v56 = vld [vmem:[%s1352_s0 + $0x68] sm:$0xff] }
   0x2   :  { %v449_v1 = vld [vmem:[%s1352_s0 + $0x220] sm:$0xff]  ;;  %4 = vst [vmem:[%s1353_s1] sm:$0xff] %v448_v0  ;;  %v453_v3 = vld [vmem:[%s1352_s0 + $0x290] sm:$0xff]  ;;  %v560_v57 = vld [vmem:[%s1352_s0 + $0x228] sm:$0xff] }
   0x3   :  { %450 = vst [vmem:[%s1353_s1 + $0x1c0] sm:$0xff] %v449_v1  ;;  %v455_v4 = vld [vmem:[%s1352_s0 + $0x140] sm:$0xff]  ;;  %v459_v6 = vld [vmem:[%s1352_s0 + $0x1b0] sm:$0xff]  ;;  %v562_v58 = vld [vmem:[%s1352_s0 + $0xd8] sm:$0xff] }
   0x4   :  { %452 = vst [vmem:[%s1353_s1 + $0x70] sm:$0xff] %v451_v2  ;;  %v457_v5 = vld [vmem:[%s1352_s0 + $0x300] sm:$0xff]  ;;  %v461_v7 = vld [vmem:[%s1352_s0 + $0x370] sm:$0xff]  ;;  %v564_v59 = vld [vmem:[%s1352_s0 + $0x298] sm:$0xff] }
   0x5   :  { %454 = vst [vmem:[%s1353_s1 + $0x230] sm:$0xff] %v453_v3  ;;  %v463_v8 = vld [vmem:[%s1352_s0 + $0x50] sm:$0xff]  ;;  %v467_v10 = vld [vmem:[%s1352_s0 + $0xc0] sm:$0xff]  ;;  %v566_v60 = vld [vmem:[%s1352_s0 + $0x148] sm:$0xff] }
   0x6   :  { %456 = vst [vmem:[%s1353_s1 + $0xe0] sm:$0xff] %v455_v4  ;;  %v465_v9 = vld [vmem:[%s1352_s0 + $0x210] sm:$0xff]  ;;  %v469_v11 = vld [vmem:[%s1352_s0 + $0x280] sm:$0xff]  ;;  %v568_v61 = vld [vmem:[%s1352_s0 + $0x308] sm:$0xff] }
   0x7   :  { %458 = vst [vmem:[%s1353_s1 + $0x2a0] sm:$0xff] %v457_v5  ;;  %v471_v12 = vld [vmem:[%s1352_s0 + $0x130] sm:$0xff]  ;;  %v475_v14 = vld [vmem:[%s1352_s0 + $0x1a0] sm:$0xff]  ;;  %v570_v62 = vld [vmem:[%s1352_s0 + $0x1b8] sm:$0xff] }
   0x8   :  { %460 = vst [vmem:[%s1353_s1 + $0x150] sm:$0xff] %v459_v6  ;;  %v473_v13 = vld [vmem:[%s1352_s0 + $0x2f0] sm:$0xff]  ;;  %v477_v15 = vld [vmem:[%s1352_s0 + $0x360] sm:$0xff]  ;;  %v572_v63 = vld [vmem:[%s1352_s0 + $0x378] sm:$0xff] }
   0x9   :  { %462 = vst [vmem:[%s1353_s1 + $0x310] sm:$0xff] %v461_v7  ;;  %v479_v16 = vld [vmem:[%s1352_s0 + $0x40] sm:$0xff]  ;;  %v483_v18 = vld [vmem:[%s1352_s0 + $0xb0] sm:$0xff]  ;;  %v574_v0 = vld [vmem:[%s1352_s0 + $0x58] sm:$0xff] }
   0xa   :  { %464 = vst [vmem:[%s1353_s1 + $0x10] sm:$0xff] %v463_v8  ;;  %v481_v17 = vld [vmem:[%s1352_s0 + $0x200] sm:$0xff]  ;;  %v485_v19 = vld [vmem:[%s1352_s0 + $0x270] sm:$0xff]  ;;  %v576_v1 = vld [vmem:[%s1352_s0 + $0x218] sm:$0xff] }
   0xb   :  { %466 = vst [vmem:[%s1353_s1 + $0x1d0] sm:$0xff] %v465_v9  ;;  %v487_v20 = vld [vmem:[%s1352_s0 + $0x120] sm:$0xff]  ;;  %v491_v22 = vld [vmem:[%s1352_s0 + $0x190] sm:$0xff]  ;;  %v578_v2 = vld [vmem:[%s1352_s0 + $0xc8] sm:$0xff] }
   0xc   :  { %468 = vst [vmem:[%s1353_s1 + $0x80] sm:$0xff] %v467_v10  ;;  %v489_v21 = vld [vmem:[%s1352_s0 + $0x2e0] sm:$0xff]  ;;  %v493_v23 = vld [vmem:[%s1352_s0 + $0x350] sm:$0xff]  ;;  %v580_v3 = vld [vmem:[%s1352_s0 + $0x288] sm:$0xff] }
   0xd   :  { %470 = vst [vmem:[%s1353_s1 + $0x240] sm:$0xff] %v469_v11  ;;  %v495_v24 = vld [vmem:[%s1352_s0 + $0x30] sm:$0xff]  ;;  %v499_v26 = vld [vmem:[%s1352_s0 + $0xa0] sm:$0xff]  ;;  %v582_v4 = vld [vmem:[%s1352_s0 + $0x138] sm:$0xff] }
   0xe   :  { %472 = vst [vmem:[%s1353_s1 + $0xf0] sm:$0xff] %v471_v12  ;;  %v497_v25 = vld [vmem:[%s1352_s0 + $0x1f0] sm:$0xff]  ;;  %v501_v27 = vld [vmem:[%s1352_s0 + $0x260] sm:$0xff]  ;;  %v584_v5 = vld [vmem:[%s1352_s0 + $0x2f8] sm:$0xff] }
   0xf   :  { %474 = vst [vmem:[%s1353_s1 + $0x2b0] sm:$0xff] %v473_v13  ;;  %v503_v28 = vld [vmem:[%s1352_s0 + $0x110] sm:$0xff]  ;;  %v507_v30 = vld [vmem:[%s1352_s0 + $0x180] sm:$0xff]  ;;  %v586_v6 = vld [vmem:[%s1352_s0 + $0x1a8] sm:$0xff] }
  0x10   :  { %476 = vst [vmem:[%s1353_s1 + $0x160] sm:$0xff] %v475_v14  ;;  %v505_v29 = vld [vmem:[%s1352_s0 + $0x2d0] sm:$0xff]  ;;  %v509_v31 = vld [vmem:[%s1352_s0 + $0x340] sm:$0xff]  ;;  %v588_v7 = vld [vmem:[%s1352_s0 + $0x368] sm:$0xff] }
  0x11   :  { %478 = vst [vmem:[%s1353_s1 + $0x320] sm:$0xff] %v477_v15  ;;  %v511_v32 = vld [vmem:[%s1352_s0 + $0x20] sm:$0xff]  ;;  %v515_v34 = vld [vmem:[%s1352_s0 + $0x90] sm:$0xff]  ;;  %v590_v8 = vld [vmem:[%s1352_s0 + $0x48] sm:$0xff] }
  0x12   :  { %480 = vst [vmem:[%s1353_s1 + $0x20] sm:$0xff] %v479_v16  ;;  %v513_v33 = vld [vmem:[%s1352_s0 + $0x1e0] sm:$0xff]  ;;  %v517_v35 = vld [vmem:[%s1352_s0 + $0x250] sm:$0xff]  ;;  %v592_v9 = vld [vmem:[%s1352_s0 + $0x208] sm:$0xff] }
  0x13   :  { %482 = vst [vmem:[%s1353_s1 + $0x1e0] sm:$0xff] %v481_v17  ;;  %v519_v36 = vld [vmem:[%s1352_s0 + $0x100] sm:$0xff]  ;;  %v523_v38 = vld [vmem:[%s1352_s0 + $0x170] sm:$0xff]  ;;  %v594_v10 = vld [vmem:[%s1352_s0 + $0xb8] sm:$0xff] }
  0x14   :  { %484 = vst [vmem:[%s1353_s1 + $0x90] sm:$0xff] %v483_v18  ;;  %v521_v37 = vld [vmem:[%s1352_s0 + $0x2c0] sm:$0xff]  ;;  %v525_v39 = vld [vmem:[%s1352_s0 + $0x330] sm:$0xff]  ;;  %v596_v11 = vld [vmem:[%s1352_s0 + $0x278] sm:$0xff] }
  0x15   :  { %486 = vst [vmem:[%s1353_s1 + $0x250] sm:$0xff] %v485_v19  ;;  %v527_v40 = vld [vmem:[%s1352_s0 + $0x10] sm:$0xff]  ;;  %v531_v42 = vld [vmem:[%s1352_s0 + $0x80] sm:$0xff]  ;;  %v598_v12 = vld [vmem:[%s1352_s0 + $0x128] sm:$0xff] }
  0x16   :  { %488 = vst [vmem:[%s1353_s1 + $0x100] sm:$0xff] %v487_v20  ;;  %v529_v41 = vld [vmem:[%s1352_s0 + $0x1d0] sm:$0xff]  ;;  %v533_v43 = vld [vmem:[%s1352_s0 + $0x240] sm:$0xff]  ;;  %v600_v13 = vld [vmem:[%s1352_s0 + $0x2e8] sm:$0xff] }
  0x17   :  { %490 = vst [vmem:[%s1353_s1 + $0x2c0] sm:$0xff] %v489_v21  ;;  %v535_v44 = vld [vmem:[%s1352_s0 + $0xf0] sm:$0xff]  ;;  %v539_v46 = vld [vmem:[%s1352_s0 + $0x160] sm:$0xff]  ;;  %v602_v14 = vld [vmem:[%s1352_s0 + $0x198] sm:$0xff] }
  0x18   :  { %492 = vst [vmem:[%s1353_s1 + $0x170] sm:$0xff] %v491_v22  ;;  %v537_v45 = vld [vmem:[%s1352_s0 + $0x2b0] sm:$0xff]  ;;  %v541_v47 = vld [vmem:[%s1352_s0 + $0x320] sm:$0xff]  ;;  %v604_v15 = vld [vmem:[%s1352_s0 + $0x358] sm:$0xff] }
  0x19   :  { %494 = vst [vmem:[%s1353_s1 + $0x330] sm:$0xff] %v493_v23  ;;  %v193_v48 = vld [vmem:[%s1352_s0] sm:$0xff]  ;;  %v546_v50 = vld [vmem:[%s1352_s0 + $0x70] sm:$0xff]  ;;  %v606_v16 = vld [vmem:[%s1352_s0 + $0x38] sm:$0xff] }
  0x1a   :  { %496 = vst [vmem:[%s1353_s1 + $0x30] sm:$0xff] %v495_v24  ;;  %v544_v49 = vld [vmem:[%s1352_s0 + $0x1c0] sm:$0xff]  ;;  %v548_v51 = vld [vmem:[%s1352_s0 + $0x230] sm:$0xff]  ;;  %v608_v17 = vld [vmem:[%s1352_s0 + $0x1f8] sm:$0xff] }
  0x1b   :  { %498 = vst [vmem:[%s1353_s1 + $0x1f0] sm:$0xff] %v497_v25  ;;  %v550_v52 = vld [vmem:[%s1352_s0 + $0xe0] sm:$0xff]  ;;  %v554_v54 = vld [vmem:[%s1352_s0 + $0x150] sm:$0xff]  ;;  %v610_v18 = vld [vmem:[%s1352_s0 + $0xa8] sm:$0xff] }
  0x1c   :  { %500 = vst [vmem:[%s1353_s1 + $0xa0] sm:$0xff] %v499_v26  ;;  %v552_v53 = vld [vmem:[%s1352_s0 + $0x2a0] sm:$0xff]  ;;  %v556_v55 = vld [vmem:[%s1352_s0 + $0x310] sm:$0xff]  ;;  %v612_v19 = vld [vmem:[%s1352_s0 + $0x268] sm:$0xff] }
  0x1d   :  { %502 = vst [vmem:[%s1353_s1 + $0x260] sm:$0xff] %v501_v27  ;;  %v614_v20 = vld [vmem:[%s1352_s0 + $0x118] sm:$0xff]  ;;  %v618_v22 = vld [vmem:[%s1352_s0 + $0x188] sm:$0xff] }
  0x1e   :  { %504 = vst [vmem:[%s1353_s1 + $0x110] sm:$0xff] %v503_v28  ;;  %v616_v21 = vld [vmem:[%s1352_s0 + $0x2d8] sm:$0xff]  ;;  %v620_v23 = vld [vmem:[%s1352_s0 + $0x348] sm:$0xff] }
  0x1f   :  { %506 = vst [vmem:[%s1353_s1 + $0x2d0] sm:$0xff] %v505_v29  ;;  %v622_v24 = vld [vmem:[%s1352_s0 + $0x28] sm:$0xff]  ;;  %v626_v26 = vld [vmem:[%s1352_s0 + $0x98] sm:$0xff] }
  0x20   :  { %508 = vst [vmem:[%s1353_s1 + $0x180] sm:$0xff] %v507_v30  ;;  %v624_v25 = vld [vmem:[%s1352_s0 + $0x1e8] sm:$0xff]  ;;  %v628_v27 = vld [vmem:[%s1352_s0 + $0x258] sm:$0xff] }
  0x21   :  { %510 = vst [vmem:[%s1353_s1 + $0x340] sm:$0xff] %v509_v31  ;;  %v630_v28 = vld [vmem:[%s1352_s0 + $0x108] sm:$0xff]  ;;  %v634_v30 = vld [vmem:[%s1352_s0 + $0x178] sm:$0xff] }
  0x22   :  { %512 = vst [vmem:[%s1353_s1 + $0x40] sm:$0xff] %v511_v32  ;;  %v632_v29 = vld [vmem:[%s1352_s0 + $0x2c8] sm:$0xff]  ;;  %v636_v31 = vld [vmem:[%s1352_s0 + $0x338] sm:$0xff] }
  0x23   :  { %514 = vst [vmem:[%s1353_s1 + $0x200] sm:$0xff] %v513_v33  ;;  %v638_v32 = vld [vmem:[%s1352_s0 + $0x18] sm:$0xff] }
  0x24   :  { %516 = vst [vmem:[%s1353_s1 + $0xb0] sm:$0xff] %v515_v34  ;;  %v640_v33 = vld [vmem:[%s1352_s0 + $0x1d8] sm:$0xff]  ;;  %v642_v34 = vld [vmem:[%s1352_s0 + $0x88] sm:$0xff] }
  0x25   :  { %518 = vst [vmem:[%s1353_s1 + $0x270] sm:$0xff] %v517_v35  ;;  %v644_v35 = vld [vmem:[%s1352_s0 + $0x248] sm:$0xff] }
  0x26   :  { %520 = vst [vmem:[%s1353_s1 + $0x120] sm:$0xff] %v519_v36  ;;  %v646_v36 = vld [vmem:[%s1352_s0 + $0xf8] sm:$0xff] }
  0x27   :  { %522 = vst [vmem:[%s1353_s1 + $0x2e0] sm:$0xff] %v521_v37  ;;  %v648_v37 = vld [vmem:[%s1352_s0 + $0x2b8] sm:$0xff] }
  0x28   :  { %524 = vst [vmem:[%s1353_s1 + $0x190] sm:$0xff] %v523_v38  ;;  %v650_v38 = vld [vmem:[%s1352_s0 + $0x168] sm:$0xff] }
  0x29   :  { %526 = vst [vmem:[%s1353_s1 + $0x350] sm:$0xff] %v525_v39  ;;  %v652_v39 = vld [vmem:[%s1352_s0 + $0x328] sm:$0xff] }
  0x2a   :  { %528 = vst [vmem:[%s1353_s1 + $0x50] sm:$0xff] %v527_v40  ;;  %v654_v40 = vld [vmem:[%s1352_s0 + $0x8] sm:$0xff] }
  0x2b   :  { %530 = vst [vmem:[%s1353_s1 + $0x210] sm:$0xff] %v529_v41  ;;  %v656_v41 = vld [vmem:[%s1352_s0 + $0x1c8] sm:$0xff] }
  0x2c   :  { %532 = vst [vmem:[%s1353_s1 + $0xc0] sm:$0xff] %v531_v42  ;;  %v658_v42 = vld [vmem:[%s1352_s0 + $0x78] sm:$0xff] }
  0x2d   :  { %534 = vst [vmem:[%s1353_s1 + $0x280] sm:$0xff] %v533_v43  ;;  %v660_v43 = vld [vmem:[%s1352_s0 + $0x238] sm:$0xff] }
  0x2e   :  { %536 = vst [vmem:[%s1353_s1 + $0x130] sm:$0xff] %v535_v44  ;;  %v662_v44 = vld [vmem:[%s1352_s0 + $0xe8] sm:$0xff] }
  0x2f   :  { %538 = vst [vmem:[%s1353_s1 + $0x2f0] sm:$0xff] %v537_v45  ;;  %v664_v45 = vld [vmem:[%s1352_s0 + $0x2a8] sm:$0xff] }
  0x30   :  { %540 = vst [vmem:[%s1353_s1 + $0x1a0] sm:$0xff] %v539_v46  ;;  %v666_v46 = vld [vmem:[%s1352_s0 + $0x158] sm:$0xff] }
  0x31   :  { %542 = vst [vmem:[%s1353_s1 + $0x360] sm:$0xff] %v541_v47  ;;  %v668_v47 = vld [vmem:[%s1352_s0 + $0x318] sm:$0xff] }
  0x32   :  { %543 = vst [vmem:[%s1353_s1 + $0x60] sm:$0xff] %v193_v48 }
  0x33   :  { %545 = vst [vmem:[%s1353_s1 + $0x220] sm:$0xff] %v544_v49 }
  0x34   :  { %547 = vst [vmem:[%s1353_s1 + $0xd0] sm:$0xff] %v546_v50 }
  0x35   :  { %549 = vst [vmem:[%s1353_s1 + $0x290] sm:$0xff] %v548_v51 }
  0x36   :  { %551 = vst [vmem:[%s1353_s1 + $0x140] sm:$0xff] %v550_v52 }
  0x37   :  { %553 = vst [vmem:[%s1353_s1 + $0x300] sm:$0xff] %v552_v53 }
  0x38   :  { %555 = vst [vmem:[%s1353_s1 + $0x1b0] sm:$0xff] %v554_v54 }
  0x39   :  { %557 = vst [vmem:[%s1353_s1 + $0x370] sm:$0xff] %v556_v55 }
  0x3a   :  { %559 = vst [vmem:[%s1353_s1 + $0x8] sm:$0xff] %v558_v56 }
  0x3b   :  { %561 = vst [vmem:[%s1353_s1 + $0x1c8] sm:$0xff] %v560_v57 }
  0x3c   :  { %563 = vst [vmem:[%s1353_s1 + $0x78] sm:$0xff] %v562_v58 }
  0x3d   :  { %565 = vst [vmem:[%s1353_s1 + $0x238] sm:$0xff] %v564_v59 }
  0x3e   :  { %567 = vst [vmem:[%s1353_s1 + $0xe8] sm:$0xff] %v566_v60 }
  0x3f   :  { %569 = vst [vmem:[%s1353_s1 + $0x2a8] sm:$0xff] %v568_v61 }
  0x40   :  { %571 = vst [vmem:[%s1353_s1 + $0x158] sm:$0xff] %v570_v62 }
  0x41   :  { %573 = vst [vmem:[%s1353_s1 + $0x318] sm:$0xff] %v572_v63 }
  0x42   :  { %575 = vst [vmem:[%s1353_s1 + $0x18] sm:$0xff] %v574_v0 }
  0x43   :  { %577 = vst [vmem:[%s1353_s1 + $0x1d8] sm:$0xff] %v576_v1 }
  0x44   :  { %579 = vst [vmem:[%s1353_s1 + $0x88] sm:$0xff] %v578_v2 }
  0x45   :  { %581 = vst [vmem:[%s1353_s1 + $0x248] sm:$0xff] %v580_v3 }
  0x46   :  { %583 = vst [vmem:[%s1353_s1 + $0xf8] sm:$0xff] %v582_v4 }
  0x47   :  { %585 = vst [vmem:[%s1353_s1 + $0x2b8] sm:$0xff] %v584_v5 }
  0x48   :  { %587 = vst [vmem:[%s1353_s1 + $0x168] sm:$0xff] %v586_v6 }
  0x49   :  { %589 = vst [vmem:[%s1353_s1 + $0x328] sm:$0xff] %v588_v7 }
  0x4a   :  { %591 = vst [vmem:[%s1353_s1 + $0x28] sm:$0xff] %v590_v8 }
  0x4b   :  { %593 = vst [vmem:[%s1353_s1 + $0x1e8] sm:$0xff] %v592_v9 }
  0x4c   :  { %595 = vst [vmem:[%s1353_s1 + $0x98] sm:$0xff] %v594_v10 }
  0x4d   :  { %597 = vst [vmem:[%s1353_s1 + $0x258] sm:$0xff] %v596_v11 }
  0x4e   :  { %599 = vst [vmem:[%s1353_s1 + $0x108] sm:$0xff] %v598_v12 }
  0x4f   :  { %601 = vst [vmem:[%s1353_s1 + $0x2c8] sm:$0xff] %v600_v13 }
  0x50   :  { %603 = vst [vmem:[%s1353_s1 + $0x178] sm:$0xff] %v602_v14 }
  0x51   :  { %605 = vst [vmem:[%s1353_s1 + $0x338] sm:$0xff] %v604_v15 }
  0x52   :  { %607 = vst [vmem:[%s1353_s1 + $0x38] sm:$0xff] %v606_v16 }
  0x53   :  { %609 = vst [vmem:[%s1353_s1 + $0x1f8] sm:$0xff] %v608_v17 }
  0x54   :  { %611 = vst [vmem:[%s1353_s1 + $0xa8] sm:$0xff] %v610_v18 }
  0x55   :  { %613 = vst [vmem:[%s1353_s1 + $0x268] sm:$0xff] %v612_v19 }
  0x56   :  { %615 = vst [vmem:[%s1353_s1 + $0x118] sm:$0xff] %v614_v20 }
  0x57   :  { %617 = vst [vmem:[%s1353_s1 + $0x2d8] sm:$0xff] %v616_v21 }
  0x58   :  { %619 = vst [vmem:[%s1353_s1 + $0x188] sm:$0xff] %v618_v22 }
  0x59   :  { %621 = vst [vmem:[%s1353_s1 + $0x348] sm:$0xff] %v620_v23 }
  0x5a   :  { %623 = vst [vmem:[%s1353_s1 + $0x48] sm:$0xff] %v622_v24 }
  0x5b   :  { %625 = vst [vmem:[%s1353_s1 + $0x208] sm:$0xff] %v624_v25 }
  0x5c   :  { %627 = vst [vmem:[%s1353_s1 + $0xb8] sm:$0xff] %v626_v26 }
  0x5d   :  { %629 = vst [vmem:[%s1353_s1 + $0x278] sm:$0xff] %v628_v27 }
  0x5e   :  { %631 = vst [vmem:[%s1353_s1 + $0x128] sm:$0xff] %v630_v28 }
  0x5f   :  { %633 = vst [vmem:[%s1353_s1 + $0x2e8] sm:$0xff] %v632_v29 }
  0x60   :  { %635 = vst [vmem:[%s1353_s1 + $0x198] sm:$0xff] %v634_v30 }
  0x61   :  { %637 = vst [vmem:[%s1353_s1 + $0x358] sm:$0xff] %v636_v31 }
  0x62   :  { %639 = vst [vmem:[%s1353_s1 + $0x58] sm:$0xff] %v638_v32 }
  0x63   :  { %641 = vst [vmem:[%s1353_s1 + $0x218] sm:$0xff] %v640_v33 }
  0x64   :  { %643 = vst [vmem:[%s1353_s1 + $0xc8] sm:$0xff] %v642_v34 }
  0x65   :  { %645 = vst [vmem:[%s1353_s1 + $0x288] sm:$0xff] %v644_v35 }
  0x66   :  { %647 = vst [vmem:[%s1353_s1 + $0x138] sm:$0xff] %v646_v36 }
  0x67   :  { %649 = vst [vmem:[%s1353_s1 + $0x2f8] sm:$0xff] %v648_v37 }
  0x68   :  { %651 = vst [vmem:[%s1353_s1 + $0x1a8] sm:$0xff] %v650_v38 }
  0x69   :  { %653 = vst [vmem:[%s1353_s1 + $0x368] sm:$0xff] %v652_v39 }
  0x6a   :  { %655 = vst [vmem:[%s1353_s1 + $0x68] sm:$0xff] %v654_v40 }
  0x6b   :  { %657 = vst [vmem:[%s1353_s1 + $0x228] sm:$0xff] %v656_v41 }
  0x6c   :  { %659 = vst [vmem:[%s1353_s1 + $0xd8] sm:$0xff] %v658_v42 }
  0x6d   :  { %661 = vst [vmem:[%s1353_s1 + $0x298] sm:$0xff] %v660_v43 }
  0x6e   :  { %663 = vst [vmem:[%s1353_s1 + $0x148] sm:$0xff] %v662_v44 }
  0x6f   :  { %665 = vst [vmem:[%s1353_s1 + $0x308] sm:$0xff] %v664_v45 }
  0x70   :  { %667 = vst [vmem:[%s1353_s1 + $0x1b8] sm:$0xff] %v666_v46 }
  0x71   :  { %669 = vst [vmem:[%s1353_s1 + $0x378] sm:$0xff] %v668_v47 }

</bundles_post_ra>
